<compile_context>
chip_gen: v7x
topology: tpu7x:2x2x1
jax: 0.10.0
libtpu: 0.0.40
codegen_flags: <defaults>
</compile_context>

<pallas_src>
import functools

import jax
import jax.numpy as jnp
from jax.experimental import pallas as pl
from jax.experimental.pallas import tpu as pltpu


def _round_up(a: int, b: int) -> int:
    return (a + b - 1) // b * b


def _choose_tiles(c_pad: int, dim_ffn: int, compute_bytes: int, out_bytes: int,
                  budget_bytes: int = 40 * 1024 * 1024):
    """Pick (tm_max, tf) so double-buffered tiles + accumulator fit the budget."""
    tm = 512
    tf = min(512, _round_up(dim_ffn, 128))

    def est(tm_, tf_):
        weights = 2 * (c_pad * tf_ + tf_ * c_pad) * compute_bytes  # 2x (double buffer)
        x_io = 2 * tm_ * c_pad * compute_bytes                      # x tiles
        o_io = 2 * tm_ * c_pad * out_bytes                          # out tiles
        acc = tm_ * c_pad * 4                                       # f32 accumulator
        return weights + x_io + o_io + acc

    while est(tm, tf) > budget_bytes and tf > 128:
        tf //= 2
    while est(tm, tf) > budget_bytes and tm > 64:
        tm //= 2
    return tm, tf


def prepare_mlp_params(w_fc, w_proj, *, compute_dtype=jnp.bfloat16,
                       out_dtype=jnp.float32):
    """One-time weight prep (do this at parameter-load time, not per call).

    w_fc:   (dim_ffn, n_embd)  -- PyTorch nn.Linear layout (out, in)
    w_proj: (n_embd, dim_ffn)
    """
    dim_ffn, n_embd = w_fc.shape
    assert w_proj.shape == (n_embd, dim_ffn)

    c_pad = _round_up(n_embd, 128)                      # lane-dense feature dim
    compute_bytes = jnp.dtype(compute_dtype).itemsize
    out_bytes = jnp.dtype(out_dtype).itemsize
    tm_max, tf = _choose_tiles(c_pad, dim_ffn, compute_bytes, out_bytes)
    f_pad = _round_up(dim_ffn, tf)

    # Transpose once + zero-pad once + cast once.
    wfc_t = jnp.zeros((c_pad, f_pad), compute_dtype)
    wfc_t = wfc_t.at[:n_embd, :dim_ffn].set(w_fc.T.astype(compute_dtype))
    wproj_t = jnp.zeros((f_pad, c_pad), compute_dtype)
    wproj_t = wproj_t.at[:dim_ffn, :n_embd].set(w_proj.T.astype(compute_dtype))

    return dict(wfc_t=wfc_t, wproj_t=wproj_t, n_embd=n_embd, dim_ffn=dim_ffn,
                c_pad=c_pad, f_pad=f_pad, tm_max=tm_max, tf=tf,
                compute_dtype=compute_dtype)


def _mlp_kernel(x_ref, wfc_ref, wproj_ref, o_ref, acc_ref):
    # x_ref:     (tm, C_pad)        activations tile (compute dtype)
    # wfc_ref:   (C_pad, tf)        W_fc^T ffn-column tile
    # wproj_ref: (tf, C_pad)        W_proj^T ffn-row tile
    # acc_ref:   (tm, C_pad) f32    resident accumulator across the ffn axis
    k = pl.program_id(1)

    @pl.when(k == 0)
    def _():
        acc_ref[...] = jnp.zeros_like(acc_ref)

    h = jnp.dot(x_ref[...], wfc_ref[...], preferred_element_type=jnp.float32)
    h = jnp.maximum(h, 0.0)                                   # ReLU (VPU, f32)
    acc_ref[...] += jnp.dot(h.astype(wproj_ref.dtype), wproj_ref[...],
                            preferred_element_type=jnp.float32)

    @pl.when(k == pl.num_programs(1) - 1)
    def _():
        o_ref[...] = acc_ref[...].astype(o_ref.dtype)


def mlp_forward(x, params):
    """x: (B, T, n_embd). Returns (B, T, n_embd) in x.dtype."""
    B, T, C = x.shape
    assert C == params["n_embd"]
    c_pad, f_pad, tf = params["c_pad"], params["f_pad"], params["tf"]
    compute_dtype = params["compute_dtype"]

    M = B * T
    tm = min(params["tm_max"], _round_up(M, 8))
    m_pad = _round_up(M, tm)

    x2 = x.reshape(M, C).astype(compute_dtype)
    if m_pad != M or c_pad != C:
        x2 = jnp.pad(x2, ((0, m_pad - M), (0, c_pad - C)))

    grid = (m_pad // tm, f_pad // tf)

    out = pl.pallas_call(
        _mlp_kernel,
        out_shape=jax.ShapeDtypeStruct((m_pad, c_pad), x.dtype),
        grid_spec=pltpu.PrefetchScalarGridSpec(
            num_scalar_prefetch=0,
            grid=grid,
            in_specs=[
                pl.BlockSpec((tm, c_pad), lambda i, k: (i, 0)),   # x rows
                pl.BlockSpec((c_pad, tf), lambda i, k: (0, k)),   # W_fc^T cols
                pl.BlockSpec((tf, c_pad), lambda i, k: (k, 0)),   # W_proj^T rows
            ],
            out_specs=pl.BlockSpec((tm, c_pad), lambda i, k: (i, 0)),
            scratch_shapes=[pltpu.VMEM((tm, c_pad), jnp.float32)],
        ),
        compiler_params=pltpu.CompilerParams(
            dimension_semantics=("parallel", "arbitrary"),
            vmem_limit_bytes=48 * 1024 * 1024,
        ),
    )(x2, params["wfc_t"], params["wproj_t"])

    return out[:M, :C].reshape(B, T, C)


if __name__ == "__main__":
    # Small shapes consistent with the module: n_embd=32, dim_ffn=128.
    B, T, C, F = 2, 8, 32, 128
    key = jax.random.PRNGKey(0)
    kx, kfc, kproj = jax.random.split(key, 3)

    x = jax.random.normal(kx, (B, T, C), dtype=jnp.float32)
    w_fc = jax.random.normal(kfc, (F, C), dtype=jnp.float32) * 0.02
    # NOTE: the PyTorch __init__ zero-inits c_proj.weight (overwritten by
    # training / checkpoints). Use nonzero weights so the second matmul is
    # actually exercised.
    w_proj = jax.random.normal(kproj, (C, F), dtype=jnp.float32) * 0.02

    # Pure-JAX reference.
    ref = jnp.maximum(x @ w_fc.T, 0.0) @ w_proj.T

    # f32 compute path: tight numerical check.
    params_f32 = prepare_mlp_params(w_fc, w_proj, compute_dtype=jnp.float32,
                                    out_dtype=x.dtype)
    y32 = jax.block_until_ready(mlp_forward(x, params_f32))
    assert y32.shape == (B, T, C)
    assert jnp.allclose(y32, ref, atol=1e-5, rtol=1e-5), "f32 mismatch vs reference"

    # bf16 compute path (the recommended production config): loose check.
    params_bf16 = prepare_mlp_params(w_fc, w_proj, compute_dtype=jnp.bfloat16,
                                     out_dtype=x.dtype)
    y16 = jax.block_until_ready(mlp_forward(x, params_bf16))
    assert y16.shape == (B, T, C)
    assert jnp.allclose(y16, ref, atol=5e-2, rtol=5e-2), "bf16 mismatch vs reference"

    print("KERNEL_OK")
</pallas_src>

<mosaic_0001>
module attributes {stable_mosaic.version = 11 : i64} {
  func.func @_mlp_kernel(%arg0: i32, %arg1: i32, %arg2: memref<16x128xf32, #tpu.memory_space<vmem>>, %arg3: memref<128x128xf32, #tpu.memory_space<vmem>>, %arg4: memref<128x128xf32, #tpu.memory_space<vmem>>, %arg5: memref<16x128xf32, #tpu.memory_space<vmem>>, %arg6: memref<16x128xf32, #tpu.memory_space<vmem>>) attributes {dimension_semantics = [#tpu.dimension_semantics<parallel>, #tpu.dimension_semantics<arbitrary>], iteration_bounds = array<i64: 1, 1>, scalar_prefetch = 0 : i64, scratch_operands = 1 : i64, tpu.core_type = #tpu.core_type<tc>, window_params = [{transform_indices = @transform_0, window_bounds = array<i64: 16, 128>}, {transform_indices = @transform_1, window_bounds = array<i64: 128, 128>}, {transform_indices = @transform_2, window_bounds = array<i64: 128, 128>}, {transform_indices = @transform_3, window_bounds = array<i64: 16, 128>}]} {
    %c0_i32 = arith.constant 0 : i32
    %0 = arith.cmpi eq, %arg1, %c0_i32 : i32
    %1 = arith.extui %0 : i1 to i32
    %c0_i32_0 = arith.constant 0 : i32
    %2 = arith.cmpi ne, %1, %c0_i32_0 : i32
    scf.if %2 {
      %cst_14 = arith.constant 0.000000e+00 : f32
      %16 = vector.broadcast %cst_14 : f32 to vector<16x128xf32>
      %c0_15 = arith.constant 0 : index
      %c0_16 = arith.constant 0 : index
      %17 = vector.load %arg6[%c0_15, %c0_16] : memref<16x128xf32, #tpu.memory_space<vmem>>, vector<16x128xf32>
      tpu.vector_store %arg6[%c0_15, %c0_16], %16 {strides = array<i32>} : memref<16x128xf32, #tpu.memory_space<vmem>>, vector<16x128xf32>,
    } else {
    }
    %c0 = arith.constant 0 : index
    %c0_1 = arith.constant 0 : index
    %3 = vector.load %arg2[%c0, %c0_1] : memref<16x128xf32, #tpu.memory_space<vmem>>, vector<16x128xf32>
    %c0_2 = arith.constant 0 : index
    %c0_3 = arith.constant 0 : index
    %4 = vector.load %arg3[%c0_2, %c0_3] : memref<128x128xf32, #tpu.memory_space<vmem>>, vector<128x128xf32>
    %cst = arith.constant dense<0.000000e+00> : vector<16x128xf32>
    %5 = tpu.matmul %3, %4, %cst {dimension_numbers = #tpu.dot_dimension_numbers<[1], [0], [0], [1], [0, 0, 1, 1], [], []>} : vector<16x128xf32>, vector<128x128xf32>, vector<16x128xf32> -> vector<16x128xf32>
    %cst_4 = arith.constant 0.000000e+00 : f32
    %6 = vector.broadcast %cst_4 : f32 to vector<16x128xf32>
    %7 = arith.maximumf %5, %6 : vector<16x128xf32>
    %c0_5 = arith.constant 0 : index
    %c0_6 = arith.constant 0 : index
    %8 = vector.load %arg6[%c0_5, %c0_6] : memref<16x128xf32, #tpu.memory_space<vmem>>, vector<16x128xf32>
    %c0_7 = arith.constant 0 : index
    %c0_8 = arith.constant 0 : index
    %9 = vector.load %arg4[%c0_7, %c0_8] : memref<128x128xf32, #tpu.memory_space<vmem>>, vector<128x128xf32>
    %cst_9 = arith.constant dense<0.000000e+00> : vector<16x128xf32>
    %10 = tpu.matmul %7, %9, %cst_9 {dimension_numbers = #tpu.dot_dimension_numbers<[1], [0], [0], [1], [0, 0, 1, 1], [], []>} : vector<16x128xf32>, vector<128x128xf32>, vector<16x128xf32> -> vector<16x128xf32>
    %11 = arith.addf %8, %10 : vector<16x128xf32>
    %c0_10 = arith.constant 0 : index
    %c0_11 = arith.constant 0 : index
    %12 = vector.load %arg6[%c0_10, %c0_11] : memref<16x128xf32, #tpu.memory_space<vmem>>, vector<16x128xf32>
    tpu.vector_store %arg6[%c0_10, %c0_11], %11 {strides = array<i32>} : memref<16x128xf32, #tpu.memory_space<vmem>>, vector<16x128xf32>,
    %c0_i32_12 = arith.constant 0 : i32
    %13 = arith.cmpi eq, %arg1, %c0_i32_12 : i32
    %14 = arith.extui %13 : i1 to i32
    %c0_i32_13 = arith.constant 0 : i32
    %15 = arith.cmpi ne, %14, %c0_i32_13 : i32
    scf.if %15 {
      %c0_14 = arith.constant 0 : index
      %c0_15 = arith.constant 0 : index
      %16 = vector.load %arg6[%c0_14, %c0_15] : memref<16x128xf32, #tpu.memory_space<vmem>>, vector<16x128xf32>
      %c0_16 = arith.constant 0 : index
      %c0_17 = arith.constant 0 : index
      %17 = vector.load %arg5[%c0_16, %c0_17] : memref<16x128xf32, #tpu.memory_space<vmem>>, vector<16x128xf32>
      tpu.vector_store %arg5[%c0_16, %c0_17], %16 {strides = array<i32>} : memref<16x128xf32, #tpu.memory_space<vmem>>, vector<16x128xf32>,
    } else {
    }
    return
  }
  func.func @transform_0(%arg0: i32, %arg1: i32) -> (i32, i32) {
    %c0_i32 = arith.constant 0 : i32
    %c0_i32_0 = arith.constant 0 : i32
    return %arg0, %c0_i32 : i32, i32
  }
  func.func @transform_1(%arg0: i32, %arg1: i32) -> (i32, i32) {
    %c0_i32 = arith.constant 0 : i32
    %c0_i32_0 = arith.constant 0 : i32
    return %c0_i32, %arg1 : i32, i32
  }
  func.func @transform_2(%arg0: i32, %arg1: i32) -> (i32, i32) {
    %c0_i32 = arith.constant 0 : i32
    %c0_i32_0 = arith.constant 0 : i32
    return %arg1, %c0_i32 : i32, i32
  }
  func.func @transform_3(%arg0: i32, %arg1: i32) -> (i32, i32) {
    %c0_i32 = arith.constant 0 : i32
    %c0_i32_0 = arith.constant 0 : i32
    return %arg0, %c0_i32 : i32, i32
  }
}

</mosaic_0001>

<bundles_post_ra>
// kernel: tpu_custom_call.1
= control target key start
LH: loop header
LB: loop body
LE: loop exit
PB: predicated region body
PF: predicated region fallthrough
CT: control target
= control target key end

     0   :  { %8 = vsyncpa [#allocation4], 0  ;;  %s642_s0 = inlined_call_operand.hbm [shape: f32[16,128], index: 0, kind: input, shape index: {}]   ;;  %s643_s1 = inlined_call_operand.hbm [shape: f32[128,128], index: 1, kind: input, shape index: {}]   ;;  %s644_s2 = inlined_call_operand.hbm [shape: f32[128,128], index: 2, kind: input, shape index: {}]   ;;  %s645_s3 = inlined_call_operand.hbm [shape: f32[16,128], index: 3, kind: output, shape index: {}]  }
   0x1   :  { %9 = vsyncpa [#allocation7], 0 }
   0x2   :  { %10 = vsyncpa [#allocation5], 0  ;;  %s549_s12 = smov [#allocation6]   ;;  %s550_s14 = smov [#allocation3]  }
   0x3   :  { %s28_s13 = sshll.u32 %s549_s12, 4  ;;  %s16_s15 = sshll.u32 %s550_s14, 4  ;;  %s29_s13 = int_to_ptr.vmem [resolvable:$true] %s28_s13  ;;  %s575_s15 = int_to_ptr.vmem [resolvable:$true] %s16_s15 }
   0x4   :  { %s455_s18 = scalar_lea.hbm %s643_s1, 2048 }
   0x5   :  { %p456_p0 = scmp.ne.s32.totalorder %s643_s1, %s455_s18  ;;  %p459_p1 = scmp.lt.u32.totalorder %s455_s18, %s643_s1 }
   0x7   :  { %p461_p2 = pnand %p459_p1, %p456_p0 }
   0x9   :  { %464 = shalt.err (!%p461_p2)
}
   0xa   :  { %s465_s23 = scalar_lea.vmem %s29_s13, 2048  ;;  %p470_p4 = scmp.lt.s32.totalorder %s29_s13, %s29_s13 }
   0xb   :  { %p466_p3 = scmp.ne.s32.totalorder %s29_s13, %s465_s23  ;;  %p471_p5 = scmp.lt.s32.totalorder %s465_s23, %s465_s23 }
   0xd   :  { %p472_p6 = por %p471_p5, %p470_p4 }
   0xf   :  { %p473_p7 = pnand %p472_p6, %p466_p3 }
  0x11   :  { %476 = shalt.err (!%p473_p7)
}
  0x12   :  { %s551_s24 = smov 128   ;;  %s552_s25 = smov 8  }
  0x13   :  { %34 = dma.hbm_to_vmem [thread:$0]  %s643_s1, 2048, %s29_s13, [#allocation7], %s551_s24, %s551_s24, %s552_s25  }
  0x14   :  { %s477_s30 = scalar_lea.hbm %s642_s0, 256 }
  0x15   :  { %p478_p8 = scmp.ne.s32.totalorder %s642_s0, %s477_s30  ;;  %p481_p9 = scmp.lt.u32.totalorder %s477_s30, %s642_s0 }
  0x17   :  { %p483_p10 = pnand %p481_p9, %p478_p8 }
  0x19   :  { %486 = shalt.err (!%p483_p10)
}
  0x1a   :  { %s487_s8 = scalar_lea.vmem %s575_s15, 256  ;;  %p492_p12 = scmp.lt.s32.totalorder %s575_s15, %s575_s15 }
  0x1b   :  { %p488_p11 = scmp.ne.s32.totalorder %s575_s15, %s487_s8  ;;  %p493_p13 = scmp.lt.s32.totalorder %s487_s8, %s487_s8 }
  0x1d   :  { %p494_p0 = por %p493_p13, %p492_p12 }
  0x1f   :  { %p495_p1 = pnand %p494_p0, %p488_p11 }
  0x21   :  { %498 = shalt.err (!%p495_p1)
}
  0x22   :  { %22 = dma.hbm_to_vmem [thread:$0]  %s642_s0, 256, %s575_s15, [#allocation4], %s551_s24, %s551_s24, %s552_s25  }
  0x23   :  { %s553_s10 = smov [#allocation8]   ;;  %s499_s14 = scalar_lea.hbm %s644_s2, 2048 }
  0x24   :  { %s40_s11 = sshll.u32 %s553_s10, 4  ;;  %p500_p2 = scmp.ne.s32.totalorder %s644_s2, %s499_s14  ;;  %s41_s11 = int_to_ptr.vmem [resolvable:$true] %s40_s11 }
  0x25   :  { %p503_p3 = scmp.lt.u32.totalorder %s499_s14, %s644_s2 }
  0x27   :  { %p505_p4 = pnand %p503_p3, %p500_p2 }
  0x29   :  { %508 = shalt.err (!%p505_p4)
}
  0x2a   :  { %s509_s20 = scalar_lea.vmem %s41_s11, 2048  ;;  %p514_p6 = scmp.lt.s32.totalorder %s41_s11, %s41_s11 }
  0x2b   :  { %p510_p5 = scmp.ne.s32.totalorder %s41_s11, %s509_s20  ;;  %p515_p7 = scmp.lt.s32.totalorder %s509_s20, %s509_s20 }
  0x2d   :  { %p516_p8 = por %p515_p7, %p514_p6 }
  0x2f   :  { %p517_p9 = pnand %p516_p8, %p510_p5 }
  0x31   :  { %520 = shalt.err (!%p517_p9)
}
  0x32   :  { %46 = dma.hbm_to_vmem [thread:$0]  %s644_s2, 2048, %s41_s11, [#allocation7], %s551_s24, %s551_s24, %s552_s25  }
  0x33   :  { %543 = dma.done.wait [#allocation4], 256  }
  0x34   :  { %544 = vsyncadd [#allocation4], 4294967040 }
  0x35   :  { %545 = dma.done.wait [#allocation7], 4096  }
  0x36   :  { %546 = vsyncadd [#allocation7], 4294963200  ;;  %v64_v0 = vld [vmem:[#allocation6] sm:$0xff]  ;;  %v65_v1 = vld [vmem:[#allocation6 + $0x8] sm:$0xff]  ;;  %s554_s2 = smov [#allocation9]  }
  0x37   :  { %v66_v2 = vld [vmem:[#allocation6 + $0x10] sm:$0xff]  ;;  %v385_v3 = vpack.c.bf16 %v65_v1, %v64_v0  ;;  %v67_v4 = vld [vmem:[#allocation6 + $0x18] sm:$0xff]  ;;  %v68_v6 = vld [vmem:[#allocation6 + $0x20] sm:$0xff]  ;;  %s266_s21 = sshll.u32 %s554_s2, 4  ;;  %s267_s21 = int_to_ptr.vmem [resolvable:$true] %s266_s21 }
  0x38   :  { %v389_v5 = vpack.c.bf16 %v67_v4, %v66_v2  ;;  %v69_v7 = vld [vmem:[#allocation6 + $0x28] sm:$0xff]  ;;  %v70_v9 = vld [vmem:[#allocation6 + $0x30] sm:$0xff]  ;;  %v71_v10 = vld [vmem:[#allocation6 + $0x38] sm:$0xff]  ;;  %s521_s22 = scalar_lea.vmem %s267_s21, 256  ;;  %p526_p11 = scmp.lt.s32.totalorder %s267_s21, %s267_s21 }
  0x39   :  { %386 = vmatprep.subr.bf16.mxu0 %v385_v3  ;;  %v393_v8 = vpack.c.bf16 %v69_v7, %v68_v6  ;;  %v62_v11 = vld [vmem:[#allocation3] sm:$0xff]  ;;  %v159_v12 = vld [vmem:[#allocation8] sm:$0xff]  ;;  %v160_v13 = vld [vmem:[#allocation8 + $0x8] sm:$0xff]  ;;  %v397_v20 = vpack.c.bf16 %v71_v10, %v70_v9  ;;  %p522_p10 = scmp.ne.s32.totalorder %s267_s21, %s521_s22  ;;  %p527_p12 = scmp.lt.s32.totalorder %s521_s22, %s521_s22 }
  0x3a   :  { %388 = vmatpush3.bf16.msra.mxu0 %v385_v3  ;;  %347 = vmatprep.mubr.f32.mxu0 %v62_v11  ;;  %v161_v14 = vld [vmem:[#allocation8 + $0x10] sm:$0xff]  ;;  %v417_v15 = vpack.c.bf16 %v160_v13, %v159_v12  ;;  %v162_v16 = vld [vmem:[#allocation8 + $0x18] sm:$0xff]  ;;  %v163_v18 = vld [vmem:[#allocation8 + $0x20] sm:$0xff] }
  0x3b   :  { %390 = vmatprep.subr.bf16.mxu0 %v389_v5  ;;  %v421_v17 = vpack.c.bf16 %v162_v16, %v161_v14  ;;  %v164_v19 = vld [vmem:[#allocation8 + $0x28] sm:$0xff]  ;;  %v72_v21 = vld [vmem:[#allocation6 + $0x40] sm:$0xff]  ;;  %v165_v24 = vld [vmem:[#allocation8 + $0x30] sm:$0xff]  ;;  %p528_p13 = por %p527_p12, %p526_p11 }
  0x3c   :  { %418 = vmatprep.subr.bf16.mxu1 %v417_v15  ;;  %v73_v22 = vld [vmem:[#allocation6 + $0x48] sm:$0xff]  ;;  %v425_v23 = vpack.c.bf16 %v164_v19, %v163_v18  ;;  %v166_v25 = vld [vmem:[#allocation8 + $0x38] sm:$0xff]  ;;  %v74_v27 = vld [vmem:[#allocation6 + $0x50] sm:$0xff] }
  0x3d   :  { %420 = vmatpush3.bf16.msra.mxu1 %v417_v15  ;;  %v401_v26 = vpack.c.bf16 %v73_v22, %v72_v21  ;;  %v75_v28 = vld [vmem:[#allocation6 + $0x58] sm:$0xff]  ;;  %v429_v29 = vpack.c.bf16 %v166_v25, %v165_v24  ;;  %v167_v30 = vld [vmem:[#allocation8 + $0x40] sm:$0xff]  ;;  %v168_v31 = vld [vmem:[#allocation8 + $0x48] sm:$0xff]  ;;  %p529_p0 = pnand %p528_p13, %p522_p10 }
  0x3e   :  { %392 = vmatpush3.bf16.msra.mxu0 %v389_v5  ;;  %422 = vmatprep.subr.bf16.mxu1 %v421_v17  ;;  %v405_v32 = vpack.c.bf16 %v75_v28, %v74_v27  ;;  %v76_v33 = vld [vmem:[#allocation6 + $0x60] sm:$0xff]  ;;  %v77_v34 = vld [vmem:[#allocation6 + $0x68] sm:$0xff]  ;;  %v433_v35 = vpack.c.bf16 %v168_v31, %v167_v30  ;;  %v169_v36 = vld [vmem:[#allocation8 + $0x50] sm:$0xff] }
  0x3f   :  { %394 = vmatprep.subr.bf16.mxu0 %v393_v8  ;;  %v170_v37 = vld [vmem:[#allocation8 + $0x58] sm:$0xff]  ;;  %v409_v38 = vpack.c.bf16 %v77_v34, %v76_v33  ;;  %v78_v39 = vld [vmem:[#allocation6 + $0x70] sm:$0xff]  ;;  %v171_v42 = vld [vmem:[#allocation8 + $0x60] sm:$0xff] }
  0x40   :  { %v79_v40 = vld [vmem:[#allocation6 + $0x78] sm:$0xff]  ;;  %v437_v41 = vpack.c.bf16 %v170_v37, %v169_v36  ;;  %v172_v43 = vld [vmem:[#allocation8 + $0x68] sm:$0xff]  ;;  %v173_v47 = vld [vmem:[#allocation8 + $0x70] sm:$0xff] }
  0x41   :  { %424 = vmatpush3.bf16.msra.mxu1 %v421_v17  ;;  %v413_v44 = vpack.c.bf16 %v79_v40, %v78_v39  ;;  %v441_v45 = vpack.c.bf16 %v172_v43, %v171_v42  ;;  %v63_v46 = vld [vmem:[#allocation3 + $0x8] sm:$0xff] }
  0x42   :  { %396 = vmatpush3.bf16.msra.mxu0 %v393_v8  ;;  %426 = vmatprep.subr.bf16.mxu1 %v425_v23  ;;  %v174_v48 = vld [vmem:[#allocation8 + $0x78] sm:$0xff] }
  0x43   :  { %398 = vmatprep.subr.bf16.mxu0 %v397_v20  ;;  %v445_v49 = vpack.c.bf16 %v174_v48, %v173_v47 }
  0x45   :  { %428 = vmatpush3.bf16.msra.mxu1 %v425_v23 }
  0x46   :  { %400 = vmatpush3.bf16.msra.mxu0 %v397_v20  ;;  %430 = vmatprep.subr.bf16.mxu1 %v429_v29 }
  0x47   :  { %402 = vmatprep.subr.bf16.mxu0 %v401_v26 }
  0x49   :  { %432 = vmatpush3.bf16.msra.mxu1 %v429_v29 }
  0x4a   :  { %404 = vmatpush3.bf16.msra.mxu0 %v401_v26  ;;  %434 = vmatprep.subr.bf16.mxu1 %v433_v35 }
  0x4b   :  { %406 = vmatprep.subr.bf16.mxu0 %v405_v32 }
  0x4d   :  { %436 = vmatpush3.bf16.msra.mxu1 %v433_v35 }
  0x4e   :  { %408 = vmatpush3.bf16.msra.mxu0 %v405_v32  ;;  %438 = vmatprep.subr.bf16.mxu1 %v437_v41 }
  0x4f   :  { %410 = vmatprep.subr.bf16.mxu0 %v409_v38 }
  0x51   :  { %440 = vmatpush3.bf16.msra.mxu1 %v437_v41 }
  0x52   :  { %412 = vmatpush3.bf16.msra.mxu0 %v409_v38  ;;  %442 = vmatprep.subr.bf16.mxu1 %v441_v45 }
  0x53   :  { %414 = vmatprep.subr.bf16.mxu0 %v413_v44 }
  0x55   :  { %444 = vmatpush3.bf16.msra.mxu1 %v441_v45 }
  0x56   :  { %416 = vmatpush3.bf16.msra.mxu0 %v413_v44  ;;  %446 = vmatprep.subr.bf16.mxu1 %v445_v49 }
  0x59   :  { %348 = vmatmul.mubr.f32.vlgmr.msra.gmra.mrb[0].mxu0 %v63_v46  ;;  %448 = vmatpush3.bf16.msra.mxu1 %v445_v49 }
 0x12c   :  { %v349_v50 = vpop.f32.mrb[0].mxu0 }
 0x12d   :  { %v146_v51 = vpop.f32.mrb[1].mxu0  ;;  %v156_v53 = vmax.f32 %v349_v50, 0.0 }
 0x12e   :  { %v155_v52 = vmax.f32 %v146_v51, 0.0 }
 0x130   :  { %382 = vmatprep.mubr.f32.mxu1 %v155_v52 }
 0x131   :  { %383 = vmatmul.mubr.f32.vlgmr.msra.gmra.mrb[0].mxu1 %v156_v53 }
 0x204   :  { %v384_v54 = vpop.f32.mrb[0].mxu1 }
 0x205   :  { %260 = vst [vmem:[#allocation9 + $0x8] sm:$0xff] %v384_v54  ;;  %v241_v55 = vpop.f32.mrb[1].mxu1 }
 0x206   :  { %259 = vst [vmem:[#allocation9] sm:$0xff] %v241_v55 }
 0x207   :  { %532 = shalt.err (!%p529_p0)
}
 0x208   :  { %s533_s27 = scalar_lea.hbm %s645_s3, 256 }
 0x209   :  { %p534_p1 = scmp.ne.s32.totalorder %s645_s3, %s533_s27  ;;  %p537_p2 = scmp.lt.u32.totalorder %s533_s27, %s645_s3 }
 0x20b   :  { %p539_p3 = pnand %p537_p2, %p534_p1 }
 0x20d   :  { %542 = shalt.err (!%p539_p3)
}
 0x20e   :  { %272 = dma.vmem_to_hbm [thread:$0]  %s267_s21, 256, %s645_s3, [#allocation5], %s551_s24, %s551_s24, %s552_s25  }
 0x20f   :  { %547 = dma.done.wait [#allocation5], 256  }
 0x210   :  { %548 = vsyncadd [#allocation5], 4294967040 }
 0x211   :  { %276 = vsyncpa [#allocation4], 1 }
 0x212   :  { %277 = vsyncpa [#allocation7], 1 }
 0x213   :  { %278 = vsyncpa [#allocation5], 1 }

</bundles_post_ra>
